<compile_context>
chip_gen: v5e
topology: v5e:2x2
jax: 0.10.0
libtpu: 0.0.40
codegen_flags: <defaults>
</compile_context>

<pallas_src>
import jax
import jax.numpy as jnp
from jax.experimental import pallas as pl
from jax.experimental.pallas import tpu as pltpu


def _round_up(a, b):
    return (a + b - 1) // b * b


def _conv1x1_prelu_kernel(a_ref, x_ref, w_ref, b_ref, o_ref):
    # a_ref: (1,)     f32  SMEM   PReLU shared alpha
    # x_ref: (C, TM)  bf16 VMEM   pixels on the lane axis
    # w_ref: (C, C)   bf16 VMEM   conv weight (rows = out channels), resident
    # b_ref: (C, 1)   f32  VMEM   bias, broadcast along lanes, resident
    # o_ref: (C, TM)  f32  VMEM
    x = x_ref[...]
    w = w_ref[...]
    y = jnp.dot(w, x, preferred_element_type=jnp.float32) + b_ref[...]
    alpha = a_ref[0]
    o_ref[...] = jnp.where(y >= 0.0, y, alpha * y)


def conv1x1_prelu(x, weight, bias, alpha, *, tile_m=512):
    """Per-pixel channel matmul + bias + PReLU.

    x: (N, C, M) input pixels (M = H*W), any float dtype.
    weight: (C_out, C_in) squeezed 1x1 conv weight.
    bias: (C,)   alpha: scalar PReLU parameter.
    Returns (N, C, M) float32.
    """
    N, C, M = x.shape

    # Lane-axis tile: as large as sensible, always a multiple of 128.
    tm = min(tile_m, _round_up(M, 128))
    m_pad = _round_up(M, tm)
    if m_pad != M:
        x = jnp.pad(x, ((0, 0), (0, 0), (0, m_pad - M)))

    x_bf = x.astype(jnp.bfloat16)
    w_bf = weight.astype(jnp.bfloat16)
    b = bias.reshape(C, 1).astype(jnp.float32)
    a = jnp.asarray(alpha, jnp.float32).reshape(1)

    grid = (N, m_pad // tm)

    # Mem-bound op (AI ~ C/3 flops/byte); tell XLA what we touch.
    bytes_accessed = (N * C * m_pad * 2        # x (bf16)
                      + C * C * 2 + C * 4 + 4  # weight, bias, alpha
                      + N * C * m_pad * 4)     # out (f32)
    flops = 2 * N * m_pad * C * C

    out = pl.pallas_call(
        _conv1x1_prelu_kernel,
        out_shape=jax.ShapeDtypeStruct((N, C, m_pad), jnp.float32),
        grid_spec=pltpu.PrefetchScalarGridSpec(
            num_scalar_prefetch=0,
            grid=grid,
            in_specs=[
                # alpha: whole (1,) array in SMEM, scalar read in the kernel.
                pl.BlockSpec(memory_space=pltpu.MemorySpace.SMEM),
                # x: (C, tm) slab per (image, pixel-tile); batch dim squeezed.
                pl.BlockSpec((None, C, tm), lambda n, i: (n, 0, i)),
                # weight / bias: constant block index -> resident in VMEM.
                pl.BlockSpec((C, C), lambda n, i: (0, 0)),
                pl.BlockSpec((C, 1), lambda n, i: (0, 0)),
            ],
            out_specs=pl.BlockSpec((None, C, tm), lambda n, i: (n, 0, i)),
        ),
        compiler_params=pltpu.CompilerParams(
            # Both axes independent -> megacore sharding on v7x.
            # VMEM use is KB-scale here, so the default scoped limit is fine on
            # v5e/v6e/v7x; set vmem_limit_bytes explicitly only if C grows large.
            dimension_semantics=("parallel", "parallel"),
        ),
        cost_estimate=pl.CostEstimate(
            flops=flops, transcendentals=0, bytes_accessed=bytes_accessed),
    )(a, x_bf, w_bf, b)

    if m_pad != M:
        out = out[:, :, :M]
    return out


def pixel_shuffle(x, r=2):
    """PyTorch nn.PixelShuffle on NCHW: (N, C*r*r, H, W) -> (N, C, H*r, W*r)."""
    N, Crr, H, W = x.shape
    C = Crr // (r * r)
    x = x.reshape(N, C, r, r, H, W)
    x = jnp.transpose(x, (0, 1, 4, 2, 5, 3))  # (N, C, H, r, W, r)
    return x.reshape(N, C, H * r, W * r)


def up_forward(x_nchw, weight, bias, alpha, *, tile_m=512):
    """Full `_up.forward`.  x_nchw: (N, C, H, W); weight: (C, C) squeezed 1x1
    conv weight; bias: (C,); alpha: scalar PReLU parameter."""
    N, C, H, W = x_nchw.shape
    # NCHW is already (C, H*W) per image -- just collapse spatial dims.
    x_flat = x_nchw.reshape(N, C, H * W)
    y_flat = conv1x1_prelu(x_flat, weight, bias, alpha, tile_m=tile_m)
    y = y_flat.reshape(N, C, H, W)
    return pixel_shuffle(y, r=2)


if __name__ == "__main__":
    # channel_in must be divisible by 4 for PixelShuffle(2).
    N, C, H, W = 2, 8, 16, 16

    key = jax.random.PRNGKey(0)
    kx, kw, kb = jax.random.split(key, 3)

    x = jax.random.normal(kx, (N, C, H, W), dtype=jnp.float32)
    weight = jax.random.normal(kw, (C, C), dtype=jnp.float32) * 0.1  # Conv2d(C,C,1) squeezed
    bias = jax.random.normal(kb, (C,), dtype=jnp.float32) * 0.1
    alpha = 0.25  # nn.PReLU() default single shared parameter

    out = up_forward(x, weight, bias, alpha)
    out = jax.block_until_ready(out)

    # PixelShuffle(2) output shape is (N, C//4, 2H, 2W).
    assert out.shape == (N, C // 4, 2 * H, 2 * W), out.shape

    # Reference in plain JAX using the same bf16-rounded inputs the kernel sees.
    xb = x.astype(jnp.bfloat16).astype(jnp.float32)
    wb = weight.astype(jnp.bfloat16).astype(jnp.float32)
    y_ref = jnp.einsum("nchw,oc->nohw", xb, wb) + bias[None, :, None, None]
    y_ref = jnp.where(y_ref >= 0, y_ref, alpha * y_ref)
    ref = pixel_shuffle(y_ref, r=2)
    assert jnp.allclose(out, ref, atol=1e-4, rtol=1e-4)

    print("KERNEL_OK")
</pallas_src>

<mosaic_0001>
module attributes {stable_mosaic.version = 11 : i64} {
  func.func @_conv1x1_prelu_kernel(%arg0: i32, %arg1: i32, %arg2: memref<1xf32, #tpu.memory_space<smem>>, %arg3: memref<1x8x256xbf16, #tpu.memory_space<vmem>>, %arg4: memref<8x8xbf16, #tpu.memory_space<vmem>>, %arg5: memref<8x1xf32, #tpu.memory_space<vmem>>, %arg6: memref<1x8x256xf32, #tpu.memory_space<vmem>>) attributes {dimension_semantics = [#tpu.dimension_semantics<parallel>, #tpu.dimension_semantics<parallel>], iteration_bounds = array<i64: 2, 1>, scalar_prefetch = 0 : i64, scratch_operands = 0 : i64, tpu.core_type = #tpu.core_type<tc>, window_params = [{transform_indices = @transform_0, window_bounds = array<i64: 1>}, {transform_indices = @transform_1, window_bounds = array<i64: 1, 8, 256>}, {pipeline_mode = #tpu.pipeline_mode<synchronous>, transform_indices = @transform_2, window_bounds = array<i64: 8, 8>}, {pipeline_mode = #tpu.pipeline_mode<synchronous>, transform_indices = @transform_3, window_bounds = array<i64: 8, 1>}, {transform_indices = @transform_4, window_bounds = array<i64: 1, 8, 256>}]} {
    %c0 = arith.constant 0 : index
    %c0_0 = arith.constant 0 : index
    %c0_1 = arith.constant 0 : index
    %0 = vector.load %arg3[%c0, %c0_0, %c0_1] : memref<1x8x256xbf16, #tpu.memory_space<vmem>>, vector<1x8x256xbf16>
    %1 = vector.shape_cast %0 : vector<1x8x256xbf16> to vector<8x256xbf16>
    %c0_2 = arith.constant 0 : index
    %c0_3 = arith.constant 0 : index
    %2 = vector.load %arg4[%c0_2, %c0_3] : memref<8x8xbf16, #tpu.memory_space<vmem>>, vector<8x8xbf16>
    %cst = arith.constant dense<0.000000e+00> : vector<8x256xf32>
    %3 = tpu.matmul %2, %1, %cst {dimension_numbers = #tpu.dot_dimension_numbers<[1], [0], [0], [1], [0, 0, 1, 1], [], []>} : vector<8x8xbf16>, vector<8x256xbf16>, vector<8x256xf32> -> vector<8x256xf32>
    %c0_4 = arith.constant 0 : index
    %c0_5 = arith.constant 0 : index
    %4 = vector.load %arg5[%c0_4, %c0_5] : memref<8x1xf32, #tpu.memory_space<vmem>>, vector<8x1xf32>
    %5 = vector.broadcast %4 : vector<8x1xf32> to vector<8x256xf32>
    %6 = arith.addf %3, %5 : vector<8x256xf32>
    %c0_6 = arith.constant 0 : index
    %7 = memref.load %arg2[%c0_6] : memref<1xf32, #tpu.memory_space<smem>>
    %cst_7 = arith.constant 0.000000e+00 : f32
    %8 = vector.broadcast %cst_7 : f32 to vector<8x256xf32>
    %9 = arith.cmpf oge, %6, %8 : vector<8x256xf32>
    %10 = vector.broadcast %7 : f32 to vector<8x256xf32>
    %11 = arith.mulf %10, %6 : vector<8x256xf32>
    %12 = arith.select %9, %6, %11 : vector<8x256xi1>, vector<8x256xf32>
    %c0_8 = arith.constant 0 : index
    %c0_9 = arith.constant 0 : index
    %c0_10 = arith.constant 0 : index
    %13 = vector.load %arg6[%c0_8, %c0_9, %c0_10] : memref<1x8x256xf32, #tpu.memory_space<vmem>>, vector<1x8x256xf32>
    %14 = vector.shape_cast %13 : vector<1x8x256xf32> to vector<8x256xf32>
    %15 = vector.shape_cast %12 : vector<8x256xf32> to vector<1x8x256xf32>
    tpu.vector_store %arg6[%c0_8, %c0_9, %c0_10], %15 {strides = array<i32>} : memref<1x8x256xf32, #tpu.memory_space<vmem>>, vector<1x8x256xf32>,
    return
  }
  func.func @transform_0(%arg0: i32, %arg1: i32) -> i32 {
    %c0_i32 = arith.constant 0 : i32
    %c0_i32_0 = arith.constant 0 : i32
    return %c0_i32 : i32
  }
  func.func @transform_1(%arg0: i32, %arg1: i32) -> (i32, i32, i32) {
    %c0_i32 = arith.constant 0 : i32
    %c0_i32_0 = arith.constant 0 : i32
    return %arg0, %c0_i32, %arg1 : i32, i32, i32
  }
  func.func @transform_2(%arg0: i32, %arg1: i32) -> (i32, i32) {
    %c0_i32 = arith.constant 0 : i32
    %c0_i32_0 = arith.constant 0 : i32
    %c0_i32_1 = arith.constant 0 : i32
    return %c0_i32, %c0_i32_0 : i32, i32
  }
  func.func @transform_3(%arg0: i32, %arg1: i32) -> (i32, i32) {
    %c0_i32 = arith.constant 0 : i32
    %c0_i32_0 = arith.constant 0 : i32
    %c0_i32_1 = arith.constant 0 : i32
    return %c0_i32, %c0_i32_0 : i32, i32
  }
  func.func @transform_4(%arg0: i32, %arg1: i32) -> (i32, i32, i32) {
    %c0_i32 = arith.constant 0 : i32
    %c0_i32_0 = arith.constant 0 : i32
    return %arg0, %c0_i32, %arg1 : i32, i32, i32
  }
}

</mosaic_0001>

<bundles_post_ra>
// kernel: tpu_custom_call.1
= control target key start
LH: loop header
LB: loop body
LE: loop exit
PB: predicated region body
PF: predicated region fallthrough
CT: control target
= control target key end

     0   :  { %s754_s0 = inlined_call_operand.<no memory space> [shape: f32[1], index: 0, kind: input, shape index: {}]   ;;  %s755_s1 = inlined_call_operand.hbm [shape: bf16[2,8,256], index: 1, kind: input, shape index: {}]   ;;  %s756_s2 = inlined_call_operand.vmem [shape: bf16[8,8], index: 2, kind: input, shape index: {}]   ;;  %s757_s3 = inlined_call_operand.vmem [shape: f32[8,1], index: 3, kind: input, shape index: {}]   ;;  %s758_s4 = inlined_call_operand.hbm [shape: f32[2,8,256], index: 4, kind: output, shape index: {}]  }
   0x1   :  { %9 = sst [smem:[#allocation2]] %s754_s0 }
   0x2   :  { %10 = vsyncpa [#allocation4], 0 }
   0x3   :  { %12 = vsyncpa [#allocation4 + $0x1], 0 }
   0x4   :  { %13 = vsyncpa [#allocation5], 0 }
   0x5   :  { %15 = vsyncpa [#allocation5 + $0x1], 0  ;;  %s627_s17 = smov 0   ;;  %s629_s18 = smov 0  }
   0x6   :  { %s631_s19 = smov 0   ;;  %s633_s20 = smov 0  }
   0x7   :  { %s635_s21 = smov 0   ;;  %s637_s22 = smov 0  }
   0x8 LB: > { %s401_s0 = sadd.s32 4294967295, %s596_s22   ;;  %s402_s23 = sadd.s32 4294967294, %s596_s22   ;;  %s596_s22 = sphi %s637_s22, %s21_s22   ;;  %s592_s21 = sphi %s635_s21, %s767_s21   ;;  %s588_s20 = sphi %s633_s20, %s766_s20   ;;  %s584_s19 = sphi %s631_s19, %s765_s19   ;;  %s580_s18 = sphi %s629_s18, %s764_s18   ;;  %s576_s17 = sphi %s627_s17, %s763_s17  }
   0x9   : > { %s33_s24 = sadd.s32 1, %s592_s21  ;;  %s63_s25 = sadd.s32 1, %s584_s19 }
   0xa   : > { %p35_p0 = scmp.ge.s32.totalorder %s33_s24, 2  ;;  %p70_p1 = scmp.ne.s32.totalorder %s584_s19, %s580_s18 }
   0xb   : > { %p71_p2 = scmp.eq.s32.totalorder %s596_s22, 0  ;;  %p76_p3 = scmp.ne.s32.totalorder %s580_s18, %s576_s17 }
   0xc   : > { %s769_s24 = smov (%p35_p0, %s33_s24), 0  ;;  %p77_p5 = scmp.eq.s32.totalorder %s401_s0, 0 }
   0xd   : > { %p668_p4 = por %p71_p2, %p70_p1  ;;  %s58_s27 = ssub.s32 %s592_s21, %s769_s24 }
   0xe   : > { %p144_p6 = scmp.eq.s32.totalorder %s401_s0, 1  ;;  %p61_p7 = scmp.eq.s32.totalorder %s58_s27, 0 }
   0xf   : > { %p674_p8 = por %p77_p5, %p76_p3  ;;  %p150_p10 = scmp.eq.s32.totalorder %s402_s23, 1 }
  0x10   : > { %p678_p9 = por %p144_p6, %p70_p1  ;;  %p404_p12 = scmp.ge.s32.totalorder %s596_s22, 2 }
  0x11   : > { %s683_s30 = scalar_select %p61_p7, %s584_s19, %s63_s25  }
  0x12   : > { %p685_p11 = por %p150_p10, %p76_p3  ;;  %p432_p13 = scmp.lt.s32.totalorder %s596_s22, 2 }
  0x13   : > { %s179_s6 = sand.u32 1, %s584_s19   ;;  %s418_s8 = sshll.u32 %s592_s21, 3 }
  0x14   : > { %s405_s7 = sshll.u32 %s179_s6, 3  ;;  %s190_s11 = scalar_lea.hbm %s755_s1, %s418_s8 }
  0x15   : > { %s183_s12 = scalar_lea.vmem [#allocation3], %s405_s7  ;;  %s192_s14 = sshll.u32 %s190_s11, 4  ;;  %s193_s14 = int_to_ptr.hbm [resolvable:$true] %s192_s14 }
  0x16   : > { %s194_s13 = sshll.u32 %s183_s12, 4  ;;  %p425_p0 = pnand %p432_p13, %p668_p4  ;;  %s195_s13 = int_to_ptr.vmem [resolvable:$true] %s194_s13 }
  0x17   : > { %p408_p1 = scmp.ge.s32.totalorder %s596_s22, 1  ;;  %p199_p2 = scmp.lt.s32.totalorder %s596_s22, 3 }
  0x18   : > { %s180_s15 = scalar_lea.sflag [#allocation4], %s179_s6 }
  0x19   : > { %427 = dma.hbm_to_vmem [thread:$0]  (!%p425_p0), %s193_s14, 128, %s195_s13, %s180_s15  }
  0x1a   : > { %p200_p3 = pnand %p408_p1, %p199_p2 }
  0x1b   : > { %s701_s16 = sand.u32 (!%p200_p3), 1, %s580_s18  }
  0x1c   : > { %203 = sbr.rel (%p200_p3) target bundleno = 179 (0xb3), region = 36  ;;  %s409_s0 = sshll.u32 (!%p200_p3), %s701_s16, 3 }
  0x1d   : > { %s206_s23 = scalar_lea.sflag (!%p200_p3), [#allocation4], %s701_s16  ;;  %s209_s25 = scalar_lea.vmem (!%p200_p3), [#allocation3], %s409_s0 }
  0x21   : > { %567 = dma.done.wait (%p674_p8), %s206_s23, 128  }
  0x22   : > { %569 = vsyncadd (%p674_p8), %s206_s23, 4294967168  ;;  %v598_v0 = vmov 0   ;;  %v238_v1 = vld [vmem:[%s209_s25] sm:$0xff]  ;;  %vm255_vm0 = vcmask 1043456   ;;  %vm251_vm1 = vcmask 64512   ;;  %s288_s7 = sld [smem:[#allocation2]] }
  0x23   : > { %483 = vset.pattern.permute.xlu0 %v598_v0  ;;  %v240_v2 = vld [vmem:[%s757_s3] sm:$0xff]  ;;  %v247_v3 = vunpack.c.l.b16 %v238_v1  ;;  %v248_v4 = vunpack.c.h.b16 %v238_v1  ;;  %s410_s8 = sshll.u32 %s701_s16, 4  ;;  %s419_s9 = sshll.u32 %s588_s20, 4 }
  0x24   : > { %243 = vperm.xlu0 %483, %v240_v2   ;;  %v239_v9 = vld [vmem:[%s756_s2] sm:$0xf]  ;;  %s312_s12 = scalar_lea.hbm %s758_s4, %s419_s9  ;;  %s234_s13 = scalar_lea.vmem [#allocation6], %s410_s8 }
  0x25   : > { %v249_v5 = vpack.c.b16 %v247_v3, %v247_v3  ;;  %v250_v6 = vpack.c.b16 %v248_v4, %v248_v4  ;;  %s314_s14 = sshll.u32 %s234_s13, 4  ;;  %s316_s15 = sshll.u32 %s312_s12, 4  ;;  %s315_s14 = int_to_ptr.vmem [resolvable:$true] %s314_s14  ;;  %s317_s15 = int_to_ptr.hbm [resolvable:$true] %s316_s15 }
  0x26   : > { %s299_s20 = scalar_lea.sflag [#allocation5], %s701_s16  ;;  %s528_s0 = sshra.s32 %s317_s15, 4  ;;  %s529_s0 = int_to_ptr.hbm [resolvable:$true] %s528_s0 }
  0x27   : > { %v257_v7 = vsel %vm255_vm0, %v249_v5, 0  ;;  %v260_v8 = vsel %vm255_vm0, %v250_v6, 0  ;;  %s530_s23 = scalar_lea.hbm %s529_s0, 16  ;;  %s534_s27 = scalar_lea.hbm %s758_s4, 32 }
  0x28   : > { %269 = vmatpush.bf16.msra.mxu0 %v257_v7  ;;  %282 = vmatpush.bf16.msra.mxu1 %v260_v8  ;;  %v291_v12 = vstv %s288_s7  ;;  %p531_p4 = scmp.ne.s32.totalorder %s529_s0, %s530_s23  ;;  %p535_p7 = scmp.lt.s32.totalorder %s529_s0, %s758_s4 }
  0x29   : > { %p536_p8 = scmp.lt.s32.totalorder %s534_s27, %s530_s23 }
  0x2a   : > { %p532_p5 = pnand %p531_p4, %p678_p9 }
  0x2b   : > { %411 = vmatmul.msk.bf16.vlgmr.msra.gmra.mxu0 %vm251_vm1, %v239_v9  ;;  %412 = vmatmul.msk.bf16.vlgmr.msra.gmra.mxu1 %vm251_vm1, %v239_v9  ;;  %p537_p10 = por %p536_p8, %p535_p7 }
  0x2c   : > { %p533_p6 = pneg %p532_p5 }
  0x2e   : > { %p538_p13 = pnand %p537_p10, %p533_p6 }
  0x96   : > { %v244_v10 = vpop.permute.xlu0 %243 }
  0xa8   : > { %v271_v11 = vpop.f32.mrf.mxu0  ;;  %v284_v13 = vpop.f32.mrf.mxu1 }
  0xa9   : > { %v272_v14 = vadd.f32 %v271_v11, %v244_v10  ;;  %v285_v15 = vadd.f32 %v284_v13, %v244_v10 }
  0xab   : > { %vm289_vm2 = vcmp.ge.f32.partialorder %v272_v14, 0.0  ;;  %v292_v16 = vmul.f32 %v291_v12, %v272_v14  ;;  %vm290_vm3 = vcmp.ge.f32.partialorder %v285_v15, 0.0  ;;  %v293_v17 = vmul.f32 %v291_v12, %v285_v15 }
  0xad   : > { %v294_v18 = vsel %vm289_vm2, %v272_v14, %v292_v16  ;;  %v295_v19 = vsel %vm290_vm3, %v285_v15, %v293_v17 }
  0xae   : > { %296 = vst [vmem:[%s234_s13] sm:$0xff] %v294_v18 }
  0xaf   : > { %297 = vst [vmem:[%s234_s13 + $0x8] sm:$0xff] %v295_v19 }
  0xb0   : > { %v273_v20 = vpop.f32.mrf.mxu0  ;;  %v286_v21 = vpop.f32.mrf.mxu1 }
  0xb1   : > { %541 = shalt.err (!%p538_p13)
}
  0xb2   : > { %422 = dma.vmem_to_hbm [thread:$0]  (%p678_p9), %s315_s14, 256, %s317_s15, %s299_s20  }
  0xb3 PF: > { %s328_s16 = sand.u32 1, %s576_s17   ;;  %p429_p0 = pnand %p404_p12, %p685_p11 }
  0xb4   : > { %s329_s7 = scalar_lea.sflag [#allocation5], %s328_s16 }
  0xb5   : > { %p430_p1 = pneg %p429_p0 }
  0xb7   : > { %571 = dma.done.wait (%p430_p1), %s329_s7, 256  }
  0xb8   : > { %573 = vsyncadd (%p430_p1), %s329_s7, 4294967040  ;;  %s21_s22 = sadd.s32 1, %s596_s22   ;;  %s763_s17 = smov %s580_s18 }
  0xb9   : > { %p18_p2 = scmp.ge.s32.totalorder %s21_s22, 4   ;;  %s764_s18 = smov %s584_s19 }
  0xba   : > { %s765_s19 = smov %s683_s30  ;;  %s766_s20 = smov %s592_s21 }
  0xbb   : > { %s767_s21 = smov %s769_s24  ;;  %20 = sbr.rel (!%p18_p2) target bundleno = 8 (0x8), region = 81 }
  0xc0   :  { %335 = vsyncpa [#allocation4], 1 }
  0xc1   :  { %337 = vsyncpa [#allocation4 + $0x1], 1 }
  0xc2   :  { %338 = vsyncpa [#allocation5], 1 }
  0xc3   :  { %340 = vsyncpa [#allocation5 + $0x1], 1 }

</bundles_post_ra>
